<compile_context>
chip_gen: v5e
topology: v5e:2x2
jax: 0.10.0
libtpu: 0.0.40
codegen_flags: <defaults>
</compile_context>

<pallas_src>
import functools

import jax
import jax.numpy as jnp
from jax.experimental import pallas as pl
from jax.experimental.pallas import tpu as pltpu


_LANE = 128
_MAX_ROW_TILE = 1024
_VMEM_TILE_BUDGET = 36 * 1024 * 1024   # bytes for the per-tile working set
_VMEM_LIMIT = 56 * 1024 * 1024         # scoped VMEM cap (< v7x 64 MiB physical)


def _round_up(x: int, m: int) -> int:
    return (x + m - 1) // m * m


def _rmsnorm_kernel(x_ref, w_ref, o_ref, *, eps: float, inv_dim: float):
    # x_ref: (tm, Dp) input tile; w_ref: (1, Dp) precomputed f32 (1 + weight).
    x = x_ref[...].astype(jnp.float32)
    # Sum (not mean) over the padded lane axis, scaled by 1/true_dim, so the
    # zero-padded lanes do not perturb the statistic.
    ms = jnp.sum(x * x, axis=-1, keepdims=True) * inv_dim
    inv = jax.lax.rsqrt(ms + eps)           # EUP rsqrt: off the VPU/ld-st slots
    o_ref[...] = (x * inv * w_ref[...]).astype(o_ref.dtype)


def gemma_rmsnorm(x: jax.Array, weight: jax.Array, eps: float = 1e-6) -> jax.Array:
    """Apply Gemma RMSNorm over the last axis of `x` using a Pallas kernel."""
    orig_shape = x.shape
    dim = orig_shape[-1]
    assert weight.shape == (dim,), (weight.shape, dim)

    rows = 1
    for s in orig_shape[:-1]:
        rows *= s

    in_bytes = jnp.dtype(x.dtype).itemsize
    sublane = max(8, 32 // in_bytes)        # 8 f32, 16 bf16, 32 int8/fp8
    dim_p = _round_up(dim, _LANE)           # lane-dense output -> unmasked vst

    # Working-set bytes per tile row:
    #   double-buffered input + double-buffered output + ~2 f32 temporaries.
    # TODO(synk): for very large hidden (>=128K) split the lane axis with an
    # in-kernel fori_loop accumulator instead of shrinking the row tile.
    per_row = dim_p * (4 * in_bytes + 8)
    rows_aligned = _round_up(rows, sublane)
    tm = min(_MAX_ROW_TILE, max(1, _VMEM_TILE_BUDGET // per_row), rows_aligned)
    tm = max(sublane, tm // sublane * sublane)
    # Prefer >=2 grid steps so the "parallel" axis can shard across 2 TCs.
    if tm >= rows_aligned and rows_aligned >= 2 * sublane:
        tm = _round_up(rows_aligned // 2, sublane)

    rows_p = _round_up(rows_aligned, tm)

    x2d = x.reshape(rows, dim)
    needs_pad = (rows_p != rows) or (dim_p != dim)
    if needs_pad:
        x2d = jnp.pad(x2d, ((0, rows_p - rows), (0, dim_p - dim)))

    # Fold (1 + weight) once, in f32; padded lanes are sliced off afterwards.
    w_row = (1.0 + weight.astype(jnp.float32)).reshape(1, dim)
    if dim_p != dim:
        w_row = jnp.pad(w_row, ((0, 0), (0, dim_p - dim)))

    out2d = pl.pallas_call(
        functools.partial(_rmsnorm_kernel, eps=eps, inv_dim=1.0 / dim),
        out_shape=jax.ShapeDtypeStruct((rows_p, dim_p), x.dtype),
        grid_spec=pltpu.PrefetchScalarGridSpec(
            num_scalar_prefetch=0,
            grid=(rows_p // tm,),
            in_specs=[
                pl.BlockSpec((tm, dim_p), lambda i: (i, 0)),   # x tile
                pl.BlockSpec((1, dim_p), lambda i: (0, 0)),    # (1+w), DMA'd once
            ],
            out_specs=pl.BlockSpec((tm, dim_p), lambda i: (i, 0)),
        ),
        compiler_params=pltpu.CompilerParams(
            dimension_semantics=("parallel",),
            vmem_limit_bytes=_VMEM_LIMIT),
    )(x2d, w_row)

    if needs_pad:
        out2d = out2d[:rows, :dim]
    return out2d.reshape(orig_shape)


def gemma_rmsnorm_ref(x: jax.Array, weight: jax.Array, eps: float = 1e-6) -> jax.Array:
    """Pure-JAX reference matching the PyTorch module semantics."""
    xf = x.astype(jnp.float32)
    normed = xf * jax.lax.rsqrt(jnp.mean(xf * xf, axis=-1, keepdims=True) + eps)
    out = normed * (1.0 + weight.astype(jnp.float32))
    return out.astype(x.dtype)


if __name__ == "__main__":
    key = jax.random.PRNGKey(0)
    kx, kw = jax.random.split(key)

    batch, seq, hidden = 2, 8, 32
    eps = 1e-6

    # Module init is weight = zeros(dim); perturb deterministically so the
    # (1 + weight) scaling path is actually exercised.
    x = jax.random.normal(kx, (batch, seq, hidden), dtype=jnp.bfloat16)
    weight = 0.1 * jax.random.normal(kw, (hidden,), dtype=jnp.float32)

    out = gemma_rmsnorm(x, weight, eps)
    out = jax.block_until_ready(out)

    ref = gemma_rmsnorm_ref(x, weight, eps)
    assert out.shape == x.shape and out.dtype == x.dtype
    err = jnp.max(jnp.abs(out.astype(jnp.float32) - ref.astype(jnp.float32)))
    assert float(err) < 1e-2, f"max abs error too large: {err}"

    print("KERNEL_OK")
</pallas_src>

<mosaic_0001>
module attributes {stable_mosaic.version = 11 : i64} {
  func.func @_rmsnorm_kernel(%arg0: i32, %arg1: memref<16x128xbf16, #tpu.memory_space<vmem>>, %arg2: memref<1x128xf32, #tpu.memory_space<vmem>>, %arg3: memref<16x128xbf16, #tpu.memory_space<vmem>>) attributes {dimension_semantics = [#tpu.dimension_semantics<parallel>], iteration_bounds = array<i64: 1>, scalar_prefetch = 0 : i64, scratch_operands = 0 : i64, tpu.core_type = #tpu.core_type<tc>, window_params = [{transform_indices = @transform_0, window_bounds = array<i64: 16, 128>}, {pipeline_mode = #tpu.pipeline_mode<synchronous>, transform_indices = @transform_1, window_bounds = array<i64: 1, 128>}, {transform_indices = @transform_2, window_bounds = array<i64: 16, 128>}]} {
    %c0 = arith.constant 0 : index
    %c0_0 = arith.constant 0 : index
    %0 = vector.load %arg1[%c0, %c0_0] : memref<16x128xbf16, #tpu.memory_space<vmem>>, vector<16x128xbf16>
    %1 = arith.extf %0 : vector<16x128xbf16> to vector<16x128xf32>
    %2 = arith.mulf %1, %1 : vector<16x128xf32>
    %cst = arith.constant dense<0.000000e+00> : vector<16xf32>
    %3 = vector.multi_reduction <add>, %2, %cst [1] : vector<16x128xf32> to vector<16xf32>
    %4 = vector.shape_cast %3 : vector<16xf32> to vector<16x1xf32>
    %cst_1 = arith.constant 3.125000e-02 : f32
    %5 = vector.broadcast %cst_1 : f32 to vector<16x1xf32>
    %6 = arith.mulf %4, %5 : vector<16x1xf32>
    %cst_2 = arith.constant 9.99999997E-7 : f32
    %7 = vector.broadcast %cst_2 : f32 to vector<16x1xf32>
    %8 = arith.addf %6, %7 : vector<16x1xf32>
    %9 = math.rsqrt %8 : vector<16x1xf32>
    %10 = vector.broadcast %9 : vector<16x1xf32> to vector<16x128xf32>
    %11 = arith.mulf %1, %10 : vector<16x128xf32>
    %c0_3 = arith.constant 0 : index
    %c0_4 = arith.constant 0 : index
    %12 = vector.load %arg2[%c0_3, %c0_4] : memref<1x128xf32, #tpu.memory_space<vmem>>, vector<1x128xf32>
    %13 = vector.broadcast %12 : vector<1x128xf32> to vector<16x128xf32>
    %14 = arith.mulf %11, %13 : vector<16x128xf32>
    %15 = arith.truncf %14 : vector<16x128xf32> to vector<16x128xbf16>
    %c0_5 = arith.constant 0 : index
    %c0_6 = arith.constant 0 : index
    %16 = vector.load %arg3[%c0_5, %c0_6] : memref<16x128xbf16, #tpu.memory_space<vmem>>, vector<16x128xbf16>
    tpu.vector_store %arg3[%c0_5, %c0_6], %15 {strides = array<i32>} : memref<16x128xbf16, #tpu.memory_space<vmem>>, vector<16x128xbf16>,
    return
  }
  func.func @transform_0(%arg0: i32) -> (i32, i32) {
    %c0_i32 = arith.constant 0 : i32
    %c0_i32_0 = arith.constant 0 : i32
    return %arg0, %c0_i32 : i32, i32
  }
  func.func @transform_1(%arg0: i32) -> (i32, i32) {
    %c0_i32 = arith.constant 0 : i32
    %c0_i32_0 = arith.constant 0 : i32
    %c0_i32_1 = arith.constant 0 : i32
    return %c0_i32, %c0_i32_0 : i32, i32
  }
  func.func @transform_2(%arg0: i32) -> (i32, i32) {
    %c0_i32 = arith.constant 0 : i32
    %c0_i32_0 = arith.constant 0 : i32
    return %arg0, %c0_i32 : i32, i32
  }
}

</mosaic_0001>

<bundles_post_ra>
// kernel: tpu_custom_call.1
= control target key start
LH: loop header
LB: loop body
LE: loop exit
PB: predicated region body
PF: predicated region fallthrough
CT: control target
= control target key end

     0   :  { %7 = vsyncpa [#allocation3], 0  ;;  %s240_s0 = inlined_call_operand.hbm [shape: bf16[16,128], index: 0, kind: input, shape index: {}]   ;;  %s241_s1 = inlined_call_operand.hbm [shape: f32[1,128], index: 1, kind: input, shape index: {}]   ;;  %s242_s2 = inlined_call_operand.hbm [shape: bf16[16,128], index: 2, kind: output, shape index: {}]  }
   0x1   :  { %8 = vsyncpa [#allocation6], 0 }
   0x2   :  { %9 = vsyncpa [#allocation4], 0  ;;  %s14_s11 = sshll.u32 %s240_s0, 4  ;;  %s205_s12 = smov [#allocation2]   ;;  %s15_s11 = int_to_ptr.hbm [resolvable:$true] %s14_s11 }
   0x3   :  { %s16_s13 = sshll.u32 %s205_s12, 4  ;;  %s28_s16 = sshll.u32 %s241_s1, 4  ;;  %s17_s13 = int_to_ptr.vmem [resolvable:$true] %s16_s13  ;;  %s29_s16 = int_to_ptr.hbm [resolvable:$true] %s28_s16 }
   0x4   :  { %s206_s17 = smov 64   ;;  %s207_s18 = smov 4  }
   0x5   :  { %22 = dma.hbm_to_vmem [thread:$0]  %s15_s11, 128, %s17_s13, [#allocation3], %s206_s17, %s206_s17, %s207_s18  }
   0x6   :  { %s208_s19 = smov [#allocation5]  }
   0x7   :  { %s30_s20 = sshll.u32 %s208_s19, 4  ;;  %s31_s20 = int_to_ptr.vmem [resolvable:$true] %s30_s20 }
   0x8   :  { %33 = dma.hbm_to_vmem [thread:$0]  %s29_s16, 16, %s31_s20, [#allocation6]  }
   0x9   :  { %199 = dma.done.wait [#allocation3], 128  }
   0xa   :  { %200 = vsyncadd [#allocation3], 4294967168 }
   0xb   :  { %201 = dma.done.wait [#allocation6], 16  }
   0xc   :  { %202 = vsyncadd [#allocation6], 4294967280  ;;  %v109_v0 = vld [vmem:[#allocation2] sm:$0xff]   ;;  %v122_v25 = vld [vmem:[#allocation5] ss:$0 sm:$0xff]  ;;  %s209_s0 = smov [#allocation7]  }
   0xd   :  { %v110_v1 = vunpack.c.l.bf16 %v109_v0  ;;  %v111_v3 = vunpack.c.h.bf16 %v109_v0  ;;  %s92_s1 = sshll.u32 %s209_s0, 4  ;;  %s94_s23 = sshll.u32 %s242_s2, 4  ;;  %s93_s1 = int_to_ptr.vmem [resolvable:$true] %s92_s1  ;;  %s95_s23 = int_to_ptr.hbm [resolvable:$true] %s94_s23 }
   0xf   :  { %v46_v2 = vmul.f32 %v110_v1, %v110_v1  ;;  %v47_v4 = vmul.f32 %v111_v3, %v111_v3 }
  0x11   :  { %48 = vadd.xlane.f32.xlu0 %v46_v2 }
  0x19   :  { %50 = vadd.xlane.f32.xlu0 %v47_v4 }
  0x84   :  { %v49_v5 = vpop.xlane.xlu0 %48 }
  0x85   :  { %v52_v6 = vmul.f32 0.03125, %v49_v5 }
  0x87   :  { %v54_v7 = vadd.f32 1e-06, %v52_v6 }
  0x89   :  { %123 = vrsqrt.f32 %v54_v7  ;;  %vm62_vm1 = vweird.f32 %v54_v7 }
  0x8c   :  { %v51_v8 = vpop.xlane.xlu0 %50 }
  0x8d   :  { %v53_v9 = vmul.f32 0.03125, %v51_v8 }
  0x8f   :  { %v124_v10 = vpop.eup %123  ;;  %v55_v11 = vadd.f32 1e-06, %v53_v9 }
  0x90   :  { %v57_v12 = vmul.f32 %v124_v10, %v54_v7  ;;  %vm63_vm0 = vweird.f32 %v124_v10 }
  0x91   :  { %125 = vrsqrt.f32 %v55_v11  ;;  %vm64_vm2 = vmor %vm62_vm1, %vm63_vm0  ;;  %vm72_vm4 = vweird.f32 %v55_v11 }
  0x92   :  { %v58_v13 = vmul.f32 %v124_v10, %v57_v12 }
  0x94   :  { %v59_v14 = vmul.f32 0.5, %v58_v13 }
  0x96   :  { %v60_v15 = vsub.f32 1.5, %v59_v14 }
  0x97   :  { %v126_v16 = vpop.eup %125 }
  0x98   :  { %v67_v17 = vmul.f32 %v126_v16, %v55_v11  ;;  %v61_v18 = vmul.f32 %v124_v10, %v60_v15  ;;  %vm73_vm3 = vweird.f32 %v126_v16 }
  0x99   :  { %vm74_vm5 = vmor %vm72_vm4, %vm73_vm3 }
  0x9a   :  { %v68_v19 = vmul.f32 %v126_v16, %v67_v17  ;;  %v65_v21 = vsel %vm64_vm2, %v124_v10, %v61_v18 }
  0x9b   :  { %v76_v24 = vmul.f32 %v110_v1, %v65_v21 }
  0x9c   :  { %v69_v20 = vmul.f32 0.5, %v68_v19 }
  0x9d   :  { %v82_v28 = vmul.f32 %v122_v25, %v76_v24 }
  0x9e   :  { %v70_v22 = vsub.f32 1.5, %v69_v20 }
  0xa0   :  { %v71_v23 = vmul.f32 %v126_v16, %v70_v22 }
  0xa2   :  { %v75_v26 = vsel %vm74_vm5, %v126_v16, %v71_v23 }
  0xa3   :  { %v77_v27 = vmul.f32 %v111_v3, %v75_v26 }
  0xa5   :  { %v83_v29 = vmul.f32 %v122_v25, %v77_v27 }
  0xa7   :  { %v115_v30 = vpack.c.bf16 %v83_v29, %v82_v28 }
  0xa9   :  { %116 = vst [vmem:[#allocation7] sm:$0xff] %v115_v30  }
  0xaa   :  { %100 = dma.vmem_to_hbm [thread:$0]  %s93_s1, 128, %s95_s23, [#allocation4], %s206_s17, %s206_s17, %s207_s18  }
  0xab   :  { %203 = dma.done.wait [#allocation4], 128  }
  0xac   :  { %204 = vsyncadd [#allocation4], 4294967168 }
  0xad   :  { %105 = vsyncpa [#allocation3], 1 }
  0xae   :  { %106 = vsyncpa [#allocation6], 1 }
  0xaf   :  { %107 = vsyncpa [#allocation4], 1 }

</bundles_post_ra>
